<compile_context>
chip_gen: v7x
topology: tpu7x:2x2x1
jax: 0.10.0
libtpu: 0.0.40
codegen_flags: <defaults>
</compile_context>

<pallas_src>
import functools

import jax
import jax.numpy as jnp
from jax.experimental import pallas as pl
from jax.experimental.pallas import tpu as pltpu


def _round_up(x, m):
    return ((x + m - 1) // m) * m


# ----------------------------- Fused Pallas kernel ---------------------------

def _fused_decoder_kernel(x_ref, state_ref, w_ref, lin_w_ref, lin_b_ref,
                          state_out_ref, out_ref, xin_ref,
                          *, hidden_pad, din_pad, dcat):
    """One grid step == one LSTM layer (single time step). Last step also runs the head.

    x_ref         : (Bp, Din_p)          padded external input (constant block, no re-DMA)
    state_ref     : (2, 1, Bp, Hp)       [h; c] for this layer (one DMA)
    w_ref         : (1, Dcat+8, 4*Hp)    [W_ih^T ; W_hh^T ; bias-row ; 0-pad] (one DMA)
    lin_w_ref     : (Hp, Op)             Linear weight, transposed + padded (resident)
    lin_b_ref     : (1, Op)              Linear bias, padded (resident)
    state_out_ref : (2, 1, Bp, Hp)       new [h; c] for this layer
    out_ref       : (Bp, Op)             linear head output (written on last step only)
    xin_ref       : (Bp, Dcat)           VMEM scratch carrying [layer_input | h_this_layer]
    """
    l = pl.program_id(0)
    num_layers = pl.num_programs(0)
    Hp = hidden_pad

    # Layer 0 consumes the external input; later layers consume the previous
    # layer's hidden output, which is already sitting in the scratch.
    @pl.when(l == 0)
    def _():
        xin_ref[:, :din_pad] = x_ref[...]

    # This layer's recurrent hidden state fills the second half of the
    # concatenated operand so the four gates come from ONE MXU matmul.
    xin_ref[:, din_pad:] = state_ref[0, 0]

    cat = xin_ref[...]                                              # (Bp, Dcat)
    gates = (jnp.dot(cat, w_ref[0, :dcat, :],
                     preferred_element_type=jnp.float32)
             + w_ref[0, dcat:dcat + 1, :])                          # (Bp, 4*Hp)

    # PyTorch gate order [i, f, g, o]; all slices are 128-lane aligned.
    i_g = jax.nn.sigmoid(gates[:, 0 * Hp:1 * Hp])
    f_g = jax.nn.sigmoid(gates[:, 1 * Hp:2 * Hp])
    g_g = jnp.tanh(gates[:, 2 * Hp:3 * Hp])
    o_g = jax.nn.sigmoid(gates[:, 3 * Hp:4 * Hp])

    c_new = f_g * state_ref[1, 0] + i_g * g_g
    h_new = o_g * jnp.tanh(c_new)

    state_out_ref[0, 0] = h_new
    state_out_ref[1, 0] = c_new

    # Feed h_new forward as the next layer's input. Columns [Hp:Din_p] of the
    # scratch (if any) multiply zero-padded weight rows for layers >= 1.
    @pl.when(l < num_layers - 1)
    def _():
        xin_ref[:, :Hp] = h_new

    # Final linear head fused into the last grid step.
    @pl.when(l == num_layers - 1)
    def _():
        out_ref[...] = (jnp.dot(h_new, lin_w_ref[...],
                                preferred_element_type=jnp.float32)
                        + lin_b_ref[...])


# ------------------------------- Param packing --------------------------------

def init_params(key, input_size, hidden_size, output_size, num_layers):
    """PyTorch-layout params (uniform(-1/sqrt(H), 1/sqrt(H)))."""
    k = 1.0 / jnp.sqrt(jnp.float32(hidden_size))
    keys = jax.random.split(key, num_layers * 4 + 2)
    lstm_params = []
    idx = 0
    for layer in range(num_layers):
        d_in = input_size if layer == 0 else hidden_size
        w_ih = jax.random.uniform(keys[idx + 0], (4 * hidden_size, d_in),
                                  jnp.float32, -k, k)
        w_hh = jax.random.uniform(keys[idx + 1], (4 * hidden_size, hidden_size),
                                  jnp.float32, -k, k)
        b_ih = jax.random.uniform(keys[idx + 2], (4 * hidden_size,),
                                  jnp.float32, -k, k)
        b_hh = jax.random.uniform(keys[idx + 3], (4 * hidden_size,),
                                  jnp.float32, -k, k)
        lstm_params.append(dict(w_ih=w_ih, w_hh=w_hh, b_ih=b_ih, b_hh=b_hh))
        idx += 4
    lin_w = jax.random.uniform(keys[idx + 0], (output_size, hidden_size),
                               jnp.float32, -k, k)
    lin_b = jax.random.uniform(keys[idx + 1], (output_size,),
                               jnp.float32, -k, k)
    return dict(lstm=lstm_params, lin_w=lin_w, lin_b=lin_b)


def _pad_gate_matrix(w_t, rows_total, H, Hp):
    """(rows_valid, 4H) gate-ordered matrix -> (rows_total, 4*Hp), zero padded
    per gate so the padded columns/rows contribute nothing."""
    rows_valid = w_t.shape[0]
    w4 = w_t.reshape(rows_valid, 4, H)
    w4 = jnp.pad(w4, ((0, rows_total - rows_valid), (0, 0), (0, Hp - H)))
    return w4.reshape(rows_total, 4 * Hp)


def pack_params(params, input_size, hidden_size, output_size):
    """One-time pre-transpose / pre-pad / pre-stack into the kernel layout."""
    H = hidden_size
    Hp = _round_up(H, 128)
    Din_p = max(_round_up(input_size, 128), Hp)
    Dcat = Din_p + Hp
    Op = _round_up(output_size, 128)
    L = len(params["lstm"])

    Ws = []
    for layer, p in enumerate(params["lstm"]):
        w_top = _pad_gate_matrix(p["w_ih"].T, Din_p, H, Hp)     # (Din_p, 4Hp)
        w_bot = _pad_gate_matrix(p["w_hh"].T, Hp, H, Hp)        # (Hp, 4Hp)
        # Bias folded in as 8 extra rows (row 0 = b_ih + b_hh, rows 1..7 zero)
        # so weight + bias arrive in a single per-layer DMA.
        b4 = (p["b_ih"] + p["b_hh"]).reshape(1, 4, H)
        b4 = jnp.pad(b4, ((0, 7), (0, 0), (0, Hp - H)))         # (8, 4, Hp)
        b_rows = b4.reshape(8, 4 * Hp)
        Ws.append(jnp.concatenate([w_top, w_bot, b_rows], axis=0))  # (Dcat+8, 4Hp)

    packed = dict(
        W=jnp.stack(Ws, axis=0),                                # (L, Dcat+8, 4Hp)
        lin_w=jnp.pad(params["lin_w"].T,
                      ((0, Hp - H), (0, Op - output_size))),    # (Hp, Op)
        lin_b=jnp.pad(params["lin_b"].reshape(1, -1),
                      ((0, 0), (0, Op - output_size))),         # (1, Op)
    )
    dims = dict(input=input_size, hidden=H, hidden_pad=Hp, din_pad=Din_p,
                dcat=Dcat, out=output_size, out_pad=Op, num_layers=L)
    return packed, dims


# --------------------------------- Forward ------------------------------------

def lstm_decoder_forward(packed, x, hidden, dims):
    """Mirrors LSTMDecoder.forward(input, hidden).

    x      : (B, input_size)
    hidden : (h0, c0), each (num_layers, B, H)
    returns: (linear_output (B, output_size), (h_n, c_n))
    """
    H, Hp = dims["hidden"], dims["hidden_pad"]
    Din, Din_p, Dcat = dims["input"], dims["din_pad"], dims["dcat"]
    O, Op = dims["out"], dims["out_pad"]
    L = dims["num_layers"]

    h0, c0 = hidden
    B = x.shape[0]
    Bp = max(8, _round_up(B, 8))

    # Cheap per-step activation padding (weights are padded once at pack time).
    xp = jnp.pad(x.astype(jnp.float32), ((0, Bp - B), (0, Din_p - Din)))
    state = jnp.stack([h0, c0], axis=0).astype(jnp.float32)        # (2, L, B, H)
    state_p = jnp.pad(state, ((0, 0), (0, 0), (0, Bp - B), (0, Hp - H)))

    kernel = functools.partial(_fused_decoder_kernel,
                               hidden_pad=Hp, din_pad=Din_p, dcat=Dcat)

    grid_spec = pltpu.PrefetchScalarGridSpec(
        num_scalar_prefetch=0,
        grid=(L,),
        in_specs=[
            pl.BlockSpec((Bp, Din_p), lambda l: (0, 0)),              # x (resident)
            pl.BlockSpec((2, 1, Bp, Hp), lambda l: (0, l, 0, 0)),     # [h;c] layer l
            pl.BlockSpec((1, Dcat + 8, 4 * Hp), lambda l: (l, 0, 0)), # W+b layer l (double-buffered)
            pl.BlockSpec((Hp, Op), lambda l: (0, 0)),                 # linear weight (resident)
            pl.BlockSpec((1, Op), lambda l: (0, 0)),                  # linear bias (resident)
        ],
        out_specs=[
            pl.BlockSpec((2, 1, Bp, Hp), lambda l: (0, l, 0, 0)),     # new [h;c] layer l
            pl.BlockSpec((Bp, Op), lambda l: (0, 0)),                 # head output
        ],
        scratch_shapes=[pltpu.VMEM((Bp, Dcat), jnp.float32)],         # layer-input carry
    )

    state_new, out_p = pl.pallas_call(
        kernel,
        grid_spec=grid_spec,
        out_shape=(
            jax.ShapeDtypeStruct((2, L, Bp, Hp), jnp.float32),
            jax.ShapeDtypeStruct((Bp, Op), jnp.float32),
        ),
        # Update the (padded) state buffer in place: state_p -> state_new.
        input_output_aliases={1: 0},
        compiler_params=pltpu.CompilerParams(
            dimension_semantics=("arbitrary",),   # layer loop is a sequential carry
            vmem_limit_bytes=32 * 1024 * 1024,
        ),
    )(xp, state_p, packed["W"], packed["lin_w"], packed["lin_b"])

    out = out_p[:B, :O]
    h_n = state_new[0, :, :B, :H]
    c_n = state_new[1, :, :B, :H]
    return out, (h_n, c_n)


# ---------------------------- Pure-JAX reference ------------------------------

def _reference_forward(params, x, hidden):
    h0, c0 = hidden
    layer_in = x
    h_list, c_list = [], []
    for layer, p in enumerate(params["lstm"]):
        gates = (layer_in @ p["w_ih"].T + p["b_ih"]
                 + h0[layer] @ p["w_hh"].T + p["b_hh"])
        H = h0.shape[-1]
        i = jax.nn.sigmoid(gates[:, 0 * H:1 * H])
        f = jax.nn.sigmoid(gates[:, 1 * H:2 * H])
        g = jnp.tanh(gates[:, 2 * H:3 * H])
        o = jax.nn.sigmoid(gates[:, 3 * H:4 * H])
        c_new = f * c0[layer] + i * g
        h_new = o * jnp.tanh(c_new)
        h_list.append(h_new)
        c_list.append(c_new)
        layer_in = h_new
    out = layer_in @ params["lin_w"].T + params["lin_b"]
    return out, (jnp.stack(h_list), jnp.stack(c_list))


# ---------------------------------- Main ---------------------------------------

if __name__ == "__main__":
    B = 2
    INPUT_SIZE = 16
    HIDDEN_SIZE = 32
    OUTPUT_SIZE = 8
    NUM_LAYERS = 2

    key = jax.random.PRNGKey(0)
    kp, kx, kh, kc = jax.random.split(key, 4)

    raw_params = init_params(kp, INPUT_SIZE, HIDDEN_SIZE, OUTPUT_SIZE, NUM_LAYERS)
    packed, dims = pack_params(raw_params, INPUT_SIZE, HIDDEN_SIZE, OUTPUT_SIZE)

    x = jax.random.normal(kx, (B, INPUT_SIZE), jnp.float32)
    h0 = jax.random.normal(kh, (NUM_LAYERS, B, HIDDEN_SIZE), jnp.float32)
    c0 = jax.random.normal(kc, (NUM_LAYERS, B, HIDDEN_SIZE), jnp.float32)

    fwd = jax.jit(lambda p, xx, hh: lstm_decoder_forward(p, xx, hh, dims))
    out, (h_n, c_n) = fwd(packed, x, (h0, c0))
    jax.block_until_ready((out, h_n, c_n))

    # Sanity check against pure-JAX reference (uses the raw PyTorch-layout params).
    ref_out, (ref_h, ref_c) = _reference_forward(raw_params, x, (h0, c0))
    assert out.shape == (B, OUTPUT_SIZE)
    assert h_n.shape == (NUM_LAYERS, B, HIDDEN_SIZE)
    assert c_n.shape == (NUM_LAYERS, B, HIDDEN_SIZE)
    assert jnp.allclose(out, ref_out, atol=1e-4, rtol=1e-4)
    assert jnp.allclose(h_n, ref_h, atol=1e-4, rtol=1e-4)
    assert jnp.allclose(c_n, ref_c, atol=1e-4, rtol=1e-4)

    print("KERNEL_OK")
</pallas_src>

<mosaic_0001>
module attributes {stable_mosaic.version = 11 : i64} {
  func.func @_fused_decoder_kernel(%arg0: i32, %arg1: memref<8x128xf32, #tpu.memory_space<vmem>>, %arg2: memref<2x1x8x128xf32, #tpu.memory_space<vmem>>, %arg3: memref<1x264x512xf32, #tpu.memory_space<vmem>>, %arg4: memref<128x128xf32, #tpu.memory_space<vmem>>, %arg5: memref<1x128xf32, #tpu.memory_space<vmem>>, %arg6: memref<2x1x8x128xf32, #tpu.memory_space<vmem>>, %arg7: memref<8x128xf32, #tpu.memory_space<vmem>>, %arg8: memref<8x256xf32, #tpu.memory_space<vmem>>) attributes {dimension_semantics = [#tpu.dimension_semantics<arbitrary>], iteration_bounds = array<i64: 2>, scalar_prefetch = 0 : i64, scratch_operands = 1 : i64, tpu.core_type = #tpu.core_type<tc>, window_params = [{pipeline_mode = #tpu.pipeline_mode<synchronous>, transform_indices = @transform_0, window_bounds = array<i64: 8, 128>}, {transform_indices = @transform_1, window_bounds = array<i64: 2, 1, 8, 128>}, {transform_indices = @transform_2, window_bounds = array<i64: 1, 264, 512>}, {pipeline_mode = #tpu.pipeline_mode<synchronous>, transform_indices = @transform_3, window_bounds = array<i64: 128, 128>}, {pipeline_mode = #tpu.pipeline_mode<synchronous>, transform_indices = @transform_4, window_bounds = array<i64: 1, 128>}, {transform_indices = @transform_5, window_bounds = array<i64: 2, 1, 8, 128>}, {pipeline_mode = #tpu.pipeline_mode<synchronous>, transform_indices = @transform_6, window_bounds = array<i64: 8, 128>}]} {
    %c0_i32 = arith.constant 0 : i32
    %0 = arith.cmpi eq, %arg0, %c0_i32 : i32
    %1 = arith.extui %0 : i1 to i32
    %c0_i32_0 = arith.constant 0 : i32
    %2 = arith.cmpi ne, %1, %c0_i32_0 : i32
    scf.if %2 {
      %c0_29 = arith.constant 0 : index
      %c0_30 = arith.constant 0 : index
      %53 = vector.load %arg1[%c0_29, %c0_30] : memref<8x128xf32, #tpu.memory_space<vmem>>, vector<8x128xf32>
      %c0_31 = arith.constant 0 : index
      %c0_32 = arith.constant 0 : index
      %54 = vector.load %arg8[%c0_31, %c0_32] : memref<8x256xf32, #tpu.memory_space<vmem>>, vector<8x128xf32>
      tpu.vector_store %arg8[%c0_31, %c0_32], %53 {strides = array<i32>} : memref<8x256xf32, #tpu.memory_space<vmem>>, vector<8x128xf32>,
    } else {
    }
    %c0 = arith.constant 0 : index
    %c0_1 = arith.constant 0 : index
    %c0_2 = arith.constant 0 : index
    %c0_3 = arith.constant 0 : index
    %3 = vector.load %arg2[%c0, %c0_1, %c0_2, %c0_3] : memref<2x1x8x128xf32, #tpu.memory_space<vmem>>, vector<1x1x8x128xf32>
    %4 = vector.shape_cast %3 : vector<1x1x8x128xf32> to vector<8x128xf32>
    %c0_4 = arith.constant 0 : index
    %c128 = arith.constant 128 : index
    %5 = vector.load %arg8[%c0_4, %c128] : memref<8x256xf32, #tpu.memory_space<vmem>>, vector<8x128xf32>
    tpu.vector_store %arg8[%c0_4, %c128], %4 {strides = array<i32>} : memref<8x256xf32, #tpu.memory_space<vmem>>, vector<8x128xf32>,
    %c0_5 = arith.constant 0 : index
    %c0_6 = arith.constant 0 : index
    %6 = vector.load %arg8[%c0_5, %c0_6] : memref<8x256xf32, #tpu.memory_space<vmem>>, vector<8x256xf32>
    %c0_7 = arith.constant 0 : index
    %c0_8 = arith.constant 0 : index
    %c0_9 = arith.constant 0 : index
    %7 = vector.load %arg3[%c0_7, %c0_8, %c0_9] : memref<1x264x512xf32, #tpu.memory_space<vmem>>, vector<1x256x512xf32>
    %8 = vector.shape_cast %7 : vector<1x256x512xf32> to vector<256x512xf32>
    %cst = arith.constant dense<0.000000e+00> : vector<8x512xf32>
    %9 = tpu.matmul %6, %8, %cst {dimension_numbers = #tpu.dot_dimension_numbers<[1], [0], [0], [1], [0, 0, 1, 1], [], []>} : vector<8x256xf32>, vector<256x512xf32>, vector<8x512xf32> -> vector<8x512xf32>
    %c0_10 = arith.constant 0 : index
    %c256 = arith.constant 256 : index
    %c0_11 = arith.constant 0 : index
    %10 = vector.load %arg3[%c0_10, %c256, %c0_11] : memref<1x264x512xf32, #tpu.memory_space<vmem>>, vector<1x1x512xf32>
    %11 = vector.shape_cast %10 : vector<1x1x512xf32> to vector<1x512xf32>
    %12 = vector.broadcast %11 : vector<1x512xf32> to vector<8x512xf32>
    %13 = arith.addf %9, %12 : vector<8x512xf32>
    %14 = vector.extract_strided_slice %13 {offsets = [0, 0], sizes = [8, 128], strides = [1, 1]} : vector<8x512xf32> to vector<8x128xf32>
    %15 = arith.negf %14 : vector<8x128xf32>
    %16 = math.exp %15 : vector<8x128xf32>
    %cst_12 = arith.constant 1.000000e+00 : f32
    %17 = vector.broadcast %cst_12 : f32 to vector<8x128xf32>
    %18 = arith.addf %17, %16 : vector<8x128xf32>
    %19 = arith.divf %17, %18 : vector<8x128xf32>
    %20 = vector.extract_strided_slice %13 {offsets = [0, 128], sizes = [8, 128], strides = [1, 1]} : vector<8x512xf32> to vector<8x128xf32>
    %21 = arith.negf %20 : vector<8x128xf32>
    %22 = math.exp %21 : vector<8x128xf32>
    %cst_13 = arith.constant 1.000000e+00 : f32
    %23 = vector.broadcast %cst_13 : f32 to vector<8x128xf32>
    %24 = arith.addf %23, %22 : vector<8x128xf32>
    %25 = arith.divf %23, %24 : vector<8x128xf32>
    %26 = vector.extract_strided_slice %13 {offsets = [0, 256], sizes = [8, 128], strides = [1, 1]} : vector<8x512xf32> to vector<8x128xf32>
    %27 = math.tanh %26 : vector<8x128xf32>
    %28 = vector.extract_strided_slice %13 {offsets = [0, 384], sizes = [8, 128], strides = [1, 1]} : vector<8x512xf32> to vector<8x128xf32>
    %29 = arith.negf %28 : vector<8x128xf32>
    %30 = math.exp %29 : vector<8x128xf32>
    %cst_14 = arith.constant 1.000000e+00 : f32
    %31 = vector.broadcast %cst_14 : f32 to vector<8x128xf32>
    %32 = arith.addf %31, %30 : vector<8x128xf32>
    %33 = arith.divf %31, %32 : vector<8x128xf32>
    %c1 = arith.constant 1 : index
    %c0_15 = arith.constant 0 : index
    %c0_16 = arith.constant 0 : index
    %c0_17 = arith.constant 0 : index
    %34 = vector.load %arg2[%c1, %c0_15, %c0_16, %c0_17] : memref<2x1x8x128xf32, #tpu.memory_space<vmem>>, vector<1x1x8x128xf32>
    %35 = vector.shape_cast %34 : vector<1x1x8x128xf32> to vector<8x128xf32>
    %36 = arith.mulf %25, %35 : vector<8x128xf32>
    %37 = arith.mulf %19, %27 : vector<8x128xf32>
    %38 = arith.addf %36, %37 : vector<8x128xf32>
    %39 = math.tanh %38 : vector<8x128xf32>
    %40 = arith.mulf %33, %39 : vector<8x128xf32>
    %c0_18 = arith.constant 0 : index
    %c0_19 = arith.constant 0 : index
    %c0_20 = arith.constant 0 : index
    %c0_21 = arith.constant 0 : index
    %41 = vector.load %arg6[%c0_18, %c0_19, %c0_20, %c0_21] : memref<2x1x8x128xf32, #tpu.memory_space<vmem>>, vector<1x1x8x128xf32>
    %42 = vector.shape_cast %41 : vector<1x1x8x128xf32> to vector<8x128xf32>
    %43 = vector.shape_cast %40 : vector<8x128xf32> to vector<1x1x8x128xf32>
    tpu.vector_store %arg6[%c0_18, %c0_19, %c0_20, %c0_21], %43 {strides = array<i32>} : memref<2x1x8x128xf32, #tpu.memory_space<vmem>>, vector<1x1x8x128xf32>,
    %c1_22 = arith.constant 1 : index
    %c0_23 = arith.constant 0 : index
    %c0_24 = arith.constant 0 : index
    %c0_25 = arith.constant 0 : index
    %44 = vector.load %arg6[%c1_22, %c0_23, %c0_24, %c0_25] : memref<2x1x8x128xf32, #tpu.memory_space<vmem>>, vector<1x1x8x128xf32>
    %45 = vector.shape_cast %44 : vector<1x1x8x128xf32> to vector<8x128xf32>
    %46 = vector.shape_cast %38 : vector<8x128xf32> to vector<1x1x8x128xf32>
    tpu.vector_store %arg6[%c1_22, %c0_23, %c0_24, %c0_25], %46 {strides = array<i32>} : memref<2x1x8x128xf32, #tpu.memory_space<vmem>>, vector<1x1x8x128xf32>,
    %c1_i32 = arith.constant 1 : i32
    %47 = arith.cmpi slt, %arg0, %c1_i32 : i32
    %48 = arith.extui %47 : i1 to i32
    %c0_i32_26 = arith.constant 0 : i32
    %49 = arith.cmpi ne, %48, %c0_i32_26 : i32
    scf.if %49 {
      %c0_29 = arith.constant 0 : index
      %c0_30 = arith.constant 0 : index
      %53 = vector.load %arg8[%c0_29, %c0_30] : memref<8x256xf32, #tpu.memory_space<vmem>>, vector<8x128xf32>
      tpu.vector_store %arg8[%c0_29, %c0_30], %40 {strides = array<i32>} : memref<8x256xf32, #tpu.memory_space<vmem>>, vector<8x128xf32>,
    } else {
    }
    %c1_i32_27 = arith.constant 1 : i32
    %50 = arith.cmpi eq, %arg0, %c1_i32_27 : i32
    %51 = arith.extui %50 : i1 to i32
    %c0_i32_28 = arith.constant 0 : i32
    %52 = arith.cmpi ne, %51, %c0_i32_28 : i32
    scf.if %52 {
      %c0_29 = arith.constant 0 : index
      %c0_30 = arith.constant 0 : index
      %53 = vector.load %arg4[%c0_29, %c0_30] : memref<128x128xf32, #tpu.memory_space<vmem>>, vector<128x128xf32>
      %cst_31 = arith.constant dense<0.000000e+00> : vector<8x128xf32>
      %54 = tpu.matmul %40, %53, %cst_31 {dimension_numbers = #tpu.dot_dimension_numbers<[1], [0], [0], [1], [0, 0, 1, 1], [], []>} : vector<8x128xf32>, vector<128x128xf32>, vector<8x128xf32> -> vector<8x128xf32>
      %c0_32 = arith.constant 0 : index
      %c0_33 = arith.constant 0 : index
      %55 = vector.load %arg5[%c0_32, %c0_33] : memref<1x128xf32, #tpu.memory_space<vmem>>, vector<1x128xf32>
      %56 = vector.broadcast %55 : vector<1x128xf32> to vector<8x128xf32>
      %57 = arith.addf %54, %56 : vector<8x128xf32>
      %c0_34 = arith.constant 0 : index
      %c0_35 = arith.constant 0 : index
      %58 = vector.load %arg7[%c0_34, %c0_35] : memref<8x128xf32, #tpu.memory_space<vmem>>, vector<8x128xf32>
      tpu.vector_store %arg7[%c0_34, %c0_35], %57 {strides = array<i32>} : memref<8x128xf32, #tpu.memory_space<vmem>>, vector<8x128xf32>,
    } else {
    }
    return
  }
  func.func @transform_0(%arg0: i32) -> (i32, i32) {
    %c0_i32 = arith.constant 0 : i32
    %c0_i32_0 = arith.constant 0 : i32
    %c0_i32_1 = arith.constant 0 : i32
    return %c0_i32, %c0_i32_0 : i32, i32
  }
  func.func @transform_1(%arg0: i32) -> (i32, i32, i32, i32) {
    %c0_i32 = arith.constant 0 : i32
    %c0_i32_0 = arith.constant 0 : i32
    %c0_i32_1 = arith.constant 0 : i32
    %c0_i32_2 = arith.constant 0 : i32
    return %c0_i32, %arg0, %c0_i32_0, %c0_i32_1 : i32, i32, i32, i32
  }
  func.func @transform_2(%arg0: i32) -> (i32, i32, i32) {
    %c0_i32 = arith.constant 0 : i32
    %c0_i32_0 = arith.constant 0 : i32
    %c0_i32_1 = arith.constant 0 : i32
    return %arg0, %c0_i32, %c0_i32_0 : i32, i32, i32
  }
  func.func @transform_3(%arg0: i32) -> (i32, i32) {
    %c0_i32 = arith.constant 0 : i32
    %c0_i32_0 = arith.constant 0 : i32
    %c0_i32_1 = arith.constant 0 : i32
    return %c0_i32, %c0_i32_0 : i32, i32
  }
  func.func @transform_4(%arg0: i32) -> (i32, i32) {
    %c0_i32 = arith.constant 0 : i32
    %c0_i32_0 = arith.constant 0 : i32
    %c0_i32_1 = arith.constant 0 : i32
    return %c0_i32, %c0_i32_0 : i32, i32
  }
  func.func @transform_5(%arg0: i32) -> (i32, i32, i32, i32) {
    %c0_i32 = arith.constant 0 : i32
    %c0_i32_0 = arith.constant 0 : i32
    %c0_i32_1 = arith.constant 0 : i32
    %c0_i32_2 = arith.constant 0 : i32
    return %c0_i32, %arg0, %c0_i32_0, %c0_i32_1 : i32, i32, i32, i32
  }
  func.func @transform_6(%arg0: i32) -> (i32, i32) {
    %c0_i32 = arith.constant 0 : i32
    %c0_i32_0 = arith.constant 0 : i32
    %c0_i32_1 = arith.constant 0 : i32
    return %c0_i32, %c0_i32_0 : i32, i32
  }
}

</mosaic_0001>

<bundles_post_ra>
// kernel: _lambda_.1
= control target key start
LH: loop header
LB: loop body
LE: loop exit
PB: predicated region body
PF: predicated region fallthrough
CT: control target
= control target key end

     0   :  { %12 = vsyncpa [#allocation5], 0  ;;  %s1752_s0 = inlined_call_operand.vmem [shape: f32[8,128], index: 0, kind: input, shape index: {}]   ;;  %s1753_s1 = inlined_call_operand.vmem [shape: f32[2,2,8,128], index: 1, kind: input, shape index: {}, may-alias: {1,5}]   ;;  %s1754_s2 = inlined_call_operand.hbm [shape: f32[2,264,512], index: 2, kind: input, shape index: {}]   ;;  %s1755_s3 = inlined_call_operand.hbm [shape: f32[128,128], index: 3, kind: input, shape index: {}]   ;;  %s1756_s4 = inlined_call_operand.hbm [shape: f32[1,128], index: 4, kind: input, shape index: {}]   ;;  %s1757_s5 = inlined_call_operand.vmem [shape: f32[2,2,8,128], index: 5, kind: output, shape index: {0}, may-alias: {1,5}]   ;;  %s1758_s6 = inlined_call_operand.vmem [shape: f32[8,128], index: 6, kind: output, shape index: {1}]  }
   0x1   :  { %14 = vsyncpa [#allocation5 + $0x1], 0 }
   0x2   :  { %15 = vsyncpa [#allocation7], 0  ;;  %s1415_s21 = smov 0   ;;  %s1417_s22 = smov 0  }
   0x3   :  { %s1419_s23 = smov 0   ;;  %s1421_s24 = smov 0  }
   0x4 LB: > { %s1434_s25 = sadd.s32 4294967295, %s1368_s24   ;;  %s1437_s26 = sadd.s32 1, %s1368_s24   ;;  %s1368_s24 = sphi %s1421_s24, %s1779_s24   ;;  %s1364_s23 = sphi %s1419_s23, %s1778_s23   ;;  %s1360_s22 = sphi %s1417_s22, %s1777_s22   ;;  %s1356_s21 = sphi %s1415_s21, %s1776_s21  }
   0x5   : > { %s46_s27 = ssub.s32 %s1368_s24, %s1437_s26  ;;  %s49_s28 = sadd.s32 1, %s1364_s23 }
   0x6   : > { %p47_p0 = scmp.eq.s32.totalorder %s46_s27, 0  ;;  %p56_p1 = scmp.ne.s32.totalorder %s1364_s23, %s1360_s22 }
   0x7   : > { %p57_p2 = scmp.eq.s32.totalorder %s1368_s24, 0  ;;  %p88_p3 = scmp.ne.s32.totalorder %s1360_s22, %s1356_s21 }
   0x8   : > { %s1447_s29 = scalar_select %p47_p0, %s1364_s23, %s49_s28  }
   0x9   : > { %p1449_p4 = por %p57_p2, %p56_p1  ;;  %p1759_p5 = scmp.eq.s32.totalorder %s1434_s25, 0 }
   0xa   : > { %p154_p6 = scmp.eq.s32.totalorder %s1434_s25, 1  ;;  %p935_p7 = scmp.ge.s32.totalorder %s1368_s24, 1 }
   0xb   : > { %s1763_s30 = scalar_select %p1449_p4, 1, 0 }
   0xc   : > { %p1458_p8 = por %p1759_p5, %p88_p3  ;;  %p188_p9 = scmp.lt.s32.totalorder %s1368_s24, 3 }
   0xd   : > { %p1463_p10 = por %p154_p6, %p56_p1  ;;  %s1370_s10 = smov [#allocation6]  }
   0xe   : > { %s1764_s7 = scalar_select %p1458_p8, 1, 0 }
   0xf   : > { %s1765_s8 = scalar_select %p1463_p10, 1, 0 }
  0x10   : > { %p1468_p12 = pnand %p935_p7, %p188_p9  ;;  %s203_s11 = sshll.u32 %s1370_s10, 4  ;;  %s204_s11 = int_to_ptr.vmem [resolvable:$true] %s203_s11 }
  0x11   : > { %s1371_s13 = smov [#allocation8]   ;;  %s1246_s17 = scalar_lea.hbm %s1755_s3, 2048 }
  0x12   : > { %s1766_s9 = scalar_select %p1468_p12, 1, 0 }
  0x13   : > { %p1178_p13 = pneg %p1468_p12  ;;  %s217_s14 = sshll.u32 %s1371_s13, 4  ;;  %s1480_s14 = int_to_ptr.vmem [resolvable:$true] %s217_s14 }
  0x14   : > { %p1247_p1 = scmp.ne.s32.totalorder %s1755_s3, %s1246_s17  ;;  %p1253_p7 = scmp.lt.u32.totalorder %s1246_s17, %s1755_s3 }
  0x15   : > { %p1476_p0 = pnand %p1178_p13, %p1759_p5 }
  0x17   : > { %p1248_p2 = pneg %p1476_p0 }
  0x19   : > { %p1249_p3 = pnand %p1248_p2, %p1247_p1 }
  0x1b   : > { %p1250_p6 = pneg %p1249_p3 }
  0x1d   : > { %p1255_p9 = pnand %p1253_p7, %p1250_p6 }
  0x1f   : > { %1258 = shalt.err (!%p1255_p9)
}
  0x20   : > { %s1259_s27 = scalar_lea.vmem %s204_s11, 2048  ;;  %p1267_p10 = scmp.lt.s32.totalorder %s204_s11, %s204_s11 }
  0x21   : > { %p1260_p13 = scmp.ne.s32.totalorder %s204_s11, %s1259_s27  ;;  %p1268_p8 = scmp.lt.s32.totalorder %s1259_s27, %s1259_s27 }
  0x23   : > { %p1262_p11 = pnand %p1260_p13, %p1248_p2  ;;  %p1269_p12 = por %p1268_p8, %p1267_p10 }
  0x25   : > { %p1263_p5 = pneg %p1262_p11 }
  0x27   : > { %p1270_p4 = pnand %p1269_p12, %p1263_p5 }
  0x29   : > { %1273 = shalt.err (!%p1270_p4)
}
  0x2a   : > { %s1372_s28 = smov 128   ;;  %s1373_s10 = smov 8  }
  0x2b   : > { %1181 = dma.hbm_to_vmem [thread:$0]  (!%p1476_p0), %s1755_s3, 2048, %s204_s11, [#allocation7], %s1372_s28, %s1372_s28, %s1373_s10  }
  0x2c   : > { %s1274_s18 = scalar_lea.hbm %s1756_s4, 16 }
  0x2d   : > { %p1275_p11 = scmp.ne.s32.totalorder %s1756_s4, %s1274_s18  ;;  %p1281_p8 = scmp.lt.u32.totalorder %s1274_s18, %s1756_s4 }
  0x2f   : > { %p1277_p4 = pnand %p1275_p11, %p1248_p2 }
  0x31   : > { %p1278_p5 = pneg %p1277_p4 }
  0x33   : > { %p1283_p10 = pnand %p1281_p8, %p1278_p5 }
  0x35   : > { %1286 = shalt.err (!%p1283_p10)
}
  0x36   : > { %s1287_s11 = scalar_lea.vmem %s1480_s14, 16  ;;  %s1294_s28 = scalar_lea.vmem %s1480_s14, 32 }
  0x37   : > { %p1288_p12 = scmp.ne.s32.totalorder %s1480_s14, %s1287_s11  ;;  %p1295_p6 = scmp.lt.s32.totalorder %s1480_s14, %s1480_s14 }
  0x38   : > { %p1296_p7 = scmp.lt.s32.totalorder %s1294_s28, %s1287_s11 }
  0x39   : > { %p1290_p1 = pnand %p1288_p12, %p1248_p2 }
  0x3a   : > { %p1297_p9 = por %p1296_p7, %p1295_p6 }
  0x3b   : > { %p1291_p3 = pneg %p1290_p1 }
  0x3d   : > { %p1298_p13 = pnand %p1297_p9, %p1291_p3 }
  0x3f   : > { %1301 = shalt.err (!%p1298_p13)
}
  0x40   : > { %1184 = dma.hbm_to_vmem [thread:$0]  (!%p1476_p0), %s1756_s4, 16, %s1480_s14, [#allocation7]  }
  0x41   : > { %p938_p11 = scmp.ge.s32.totalorder %s1368_s24, 2 }
  0x42   : > { %p1768_p2 = scmp.ne.s32.totalorder (!%p938_p11), %s1763_s30, 0 }
  0x43   : > { %224 = sbr.rel (%p938_p11) target bundleno = 108 (0x6c), region = 28 }
  0x4a   : > { %227 = sbr.rel (!%p1768_p2) target bundleno = 81 (0x51), region = 32  ;;  %s229_s15 = sand.u32 (%p1768_p2), 1, %s1364_s23  }
  0x4b   : > { %s940_s16 = sshll.u32 (%p1768_p2), %s1368_s24, 3  ;;  %s939_s17 = sshll.u32 (%p1768_p2), %s229_s15, 4 }
  0x4c   : > { %s233_s12 = scalar_lea.vmem (%p1768_p2), %s1753_s1, %s940_s16  ;;  %s231_s20 = scalar_lea.vmem (%p1768_p2), [#allocation3], %s939_s17 }
  0x4d   : > { %v263_v0 = vld [vmem:[%s233_s12] sm:$0xff] (%p1768_p2)  ;;  %v265_v1 = vld [vmem:[%s233_s12 + $0x10] sm:$0xff] (%p1768_p2) }
  0x4e   : > { %264 = vst [vmem:[%s231_s20] sm:$0xff] (%p1768_p2), %v263_v0  ;;  %266 = vst [vmem:[%s231_s20 + $0x8] sm:$0xff] (%p1768_p2), %v265_v1 }
  0x51 PF: > { %s273_s14 = sand.u32 1, %s1364_s23   ;;  %s1166_s21 = smul.u32 16896, %s1368_s24 }
  0x52   : > { %s1165_s27 = smul.u32 1056, %s273_s14  ;;  %s1547_s16 = scalar_lea.sflag [#allocation5], %s273_s14 }
  0x53   : > { %s1543_s10 = scalar_lea.hbm %s1754_s2, %s1166_s21  ;;  %p1769_p4 = scmp.ne.s32.totalorder %s1763_s30, 0 }
  0x54   : > { %s277_s13 = scalar_lea.vmem [#allocation4], %s1165_s27  ;;  %s1302_s17 = scalar_lea.hbm %s1543_s10, 16896 }
  0x55   : > { %s284_s15 = sshll.u32 %s277_s13, 4  ;;  %p1303_p0 = scmp.ne.s32.totalorder %s1543_s10, %s1302_s17  ;;  %s1545_s15 = int_to_ptr.vmem [resolvable:$true] %s284_s15 }
  0x56   : > { %s1306_s19 = scalar_lea.hbm %s1754_s2, 33792  ;;  %p1307_p10 = scmp.lt.u32.totalorder %s1543_s10, %s1754_s2 }
  0x57   : > { %p1304_p5 = pnand %p1303_p0, %p1769_p4  ;;  %p1308_p12 = scmp.lt.u32.totalorder %s1306_s19, %s1302_s17 }
  0x58   : > { %p1310_p3 = scmp.lt.u32.totalorder %s1302_s17, %s1543_s10 }
  0x59   : > { %p1305_p8 = pneg %p1304_p5  ;;  %p1309_p1 = por %p1308_p12, %p1307_p10 }
  0x5b   : > { %p1311_p6 = por %p1310_p3, %p1309_p1 }
  0x5d   : > { %p1312_p7 = pnand %p1311_p6, %p1305_p8 }
  0x5f   : > { %1315 = shalt.err (!%p1312_p7)
}
  0x60   : > { %s1316_s14 = scalar_lea.vmem %s1545_s15, 16896  ;;  %s1374_s21 = smov [#allocation4]  }
  0x61   : > { %p1317_p9 = scmp.ne.s32.totalorder %s1545_s15, %s1316_s14  ;;  %s1320_s27 = sshll.u32 %s1374_s21, 4  ;;  %s1321_s27 = int_to_ptr.vmem [resolvable:$false] %s1320_s27 }
  0x62   : > { %s1322_s11 = scalar_lea.vmem %s1321_s27, 33792  ;;  %p1323_p2 = scmp.lt.s32.totalorder %s1545_s15, %s1321_s27 }
  0x63   : > { %p1318_p13 = pnand %p1317_p9, %p1769_p4  ;;  %p1324_p0 = scmp.lt.s32.totalorder %s1322_s11, %s1316_s14 }
  0x65   : > { %p1319_p11 = pneg %p1318_p13  ;;  %p1325_p5 = por %p1324_p0, %p1323_p2 }
  0x67   : > { %p1326_p10 = pnand %p1325_p5, %p1319_p11 }
  0x69   : > { %1329 = shalt.err (!%p1326_p10)
}
  0x6a   : > { %s1375_s28 = smov 512   ;;  %s1376_s13 = smov 32  }
  0x6b   : > { %1172 = dma.hbm_to_vmem [thread:$0]  (%p1769_p4), %s1543_s10, 16896, %s1545_s15, %s1547_s16, %s1375_s28, %s1375_s28, %s1376_s13  }
  0x6c PF: > { %p1770_p8 = scmp.ne.s32.totalorder %s1766_s9, 0 }
  0x6d   : > { %s299_s17 = sand.u32 (!%p1770_p8), 1, %s1360_s22   ;;  %p1771_p12 = scmp.ne.s32.totalorder (!%p1770_p8), %s1764_s7, 0 }
  0x6e   : > { %296 = sbr.rel (%p1770_p8) target bundleno = 716 (0x2cc), region = 74  ;;  %s943_s24 = sshll.u32 (!%p1770_p8), %s299_s17, 4 }
  0x6f   : > { %s1167_s18 = smul.u32 (!%p1770_p8), 1056, %s299_s17  ;;  %s1574_s19 = scalar_lea.vmem (!%p1770_p8), [#allocation3], %s943_s24 }
  0x70   : > { %s306_s12 = scalar_lea.sflag (!%p1770_p8), [#allocation5], %s299_s17 }
  0x71   : > { %s1576_s20 = scalar_lea.vmem (!%p1770_p8), [#allocation4], %s1167_s18 }
  0x75   : > { %1347 = dma.done.wait (%p1771_p12), %s306_s12, 16896  }
  0x76   : > { %1349 = vsyncadd (%p1771_p12), %s306_s12, 4294950400  ;;  %p1772_p4 = scmp.eq.s32.totalorder %s1434_s25, 0 }
  0x78   : > { %1351 = dma.done.wait (%p1772_p4), [#allocation7], 2064   ;;  %p1773_p1 = pmov %p1772_p4 }
  0x79   : > { %s1586_s30 = scalar_lea.vmem [#allocation9], %s943_s24  ;;  %p1774_p3 = scmp.ne.s32.totalorder %s1434_s25, 0 }
  0x7a   : > { %1353 = vsyncadd (%p1773_p1), [#allocation7], 4294965232  ;;  %v353_v2 = vld [vmem:[%s1752_s0] sm:$0xff] (!%p1774_p3) }
  0x7b   : > { %352 = sbr.rel (%p1774_p3) target bundleno = 130 (0x82), region = 94  ;;  %354 = vst [vmem:[#allocation2] sm:$0xff] (!%p1774_p3), %v353_v2 }
  0x82 PF: > { %v360_v3 = vld [vmem:[%s1576_s20 + $0x8] sm:$0xff]  ;;  %v359_v5 = vld [vmem:[%s1576_s20] sm:$0xff]  ;;  %v362_v21 = vld [vmem:[%s1576_s20 + $0x18] sm:$0xff]  ;;  %p954_p6 = scmp.ge.s32.totalorder %s1434_s25, 1 }
  0x83   : > { %v364_v4 = vld [vmem:[%s1576_s20 + $0x28] sm:$0xff]  ;;  %v363_v7 = vld [vmem:[%s1576_s20 + $0x20] sm:$0xff]  ;;  %v366_v22 = vld [vmem:[%s1576_s20 + $0x38] sm:$0xff] }
  0x84   : > { %v1013_v6 = vpack.c.bf16 %v364_v4, %v360_v3  ;;  %v368_v8 = vld [vmem:[%s1576_s20 + $0x48] sm:$0xff]  ;;  %v1015_v10 = vpack.c.bf16 %v363_v7, %v359_v5  ;;  %v367_v12 = vld [vmem:[%s1576_s20 + $0x40] sm:$0xff]  ;;  %v1077_v24 = vpack.c.bf16 %v366_v22, %v362_v21  ;;  %v361_v25 = vld [vmem:[%s1576_s20 + $0x10] sm:$0xff] }
  0x85   : > { %v372_v9 = vld [vmem:[%s1576_s20 + $0x68] sm:$0xff]  ;;  %v371_v13 = vld [vmem:[%s1576_s20 + $0x60] sm:$0xff]  ;;  %v365_v26 = vld [vmem:[%s1576_s20 + $0x30] sm:$0xff] }
  0x86   : > { %v1017_v11 = vpack.c.bf16 %v372_v9, %v368_v8  ;;  %v376_v14 = vld [vmem:[%s1576_s20 + $0x88] sm:$0xff]  ;;  %1014 = vmatprep.subr.bf16.mxu0 %v1013_v6  ;;  %v1019_v16 = vpack.c.bf16 %v371_v13, %v367_v12  ;;  %v375_v17 = vld [vmem:[%s1576_s20 + $0x80] sm:$0xff]  ;;  %v1079_v27 = vpack.c.bf16 %v365_v26, %v361_v25  ;;  %1078 = vmatprep.subr.bf16.mxu1 %v1077_v24  ;;  %v370_v29 = vld [vmem:[%s1576_s20 + $0x58] sm:$0xff] }
  0x87   : > { %v380_v15 = vld [vmem:[%s1576_s20 + $0xa8] sm:$0xff]  ;;  %1016 = vmatpush1.bf16.msra.mxu0 %v1015_v10  ;;  %v379_v18 = vld [vmem:[%s1576_s20 + $0xa0] sm:$0xff]  ;;  %v374_v30 = vld [vmem:[%s1576_s20 + $0x78] sm:$0xff] }
  0x88   : > { %1018 = vmatprep.subr.bf16.mxu0 %v1017_v11  ;;  %v1021_v19 = vpack.c.bf16 %v380_v15, %v376_v14  ;;  %v384_v20 = vld [vmem:[%s1576_s20 + $0xc8] sm:$0xff]  ;;  %v1023_v28 = vpack.c.bf16 %v379_v18, %v375_v17  ;;  %v369_v31 = vld [vmem:[%s1576_s20 + $0x50] sm:$0xff]  ;;  %v383_v33 = vld [vmem:[%s1576_s20 + $0xc0] sm:$0xff]  ;;  %1080 = vmatpush1.bf16.msra.mxu1 %v1079_v27  ;;  %v1081_v35 = vpack.c.bf16 %v374_v30, %v370_v29 }
  0x89   : > { %v388_v23 = vld [vmem:[%s1576_s20 + $0xe8] sm:$0xff]  ;;  %v387_v34 = vld [vmem:[%s1576_s20 + $0xe0] sm:$0xff]  ;;  %v373_v36 = vld [vmem:[%s1576_s20 + $0x70] sm:$0xff] }
  0x8a   : > { %v1025_v32 = vpack.c.bf16 %v388_v23, %v384_v20  ;;  %v392_v37 = vld [vmem:[%s1576_s20 + $0x108] sm:$0xff]  ;;  %v1083_v39 = vpack.c.bf16 %v373_v36, %v369_v31  ;;  %v378_v40 = vld [vmem:[%s1576_s20 + $0x98] sm:$0xff]  ;;  %1082 = vmatprep.subr.bf16.mxu1 %v1081_v35  ;;  %v377_v42 = vld [vmem:[%s1576_s20 + $0x90] sm:$0xff]  ;;  %v1027_v44 = vpack.c.bf16 %v387_v34, %v383_v33 }
  0x8b   : > { %1020 = vmatpush1.bf16.msra.mxu0 %v1019_v16  ;;  %v396_v38 = vld [vmem:[%s1576_s20 + $0x128] sm:$0xff]  ;;  %v382_v41 = vld [vmem:[%s1576_s20 + $0xb8] sm:$0xff]  ;;  %v381_v43 = vld [vmem:[%s1576_s20 + $0xb0] sm:$0xff] }
  0x8c   : > { %1022 = vmatprep.subr.bf16.mxu0 %v1021_v19  ;;  %v391_v45 = vld [vmem:[%s1576_s20 + $0x100] sm:$0xff]  ;;  %v1085_v47 = vpack.c.bf16 %v382_v41, %v378_v40  ;;  %v1029_v48 = vpack.c.bf16 %v396_v38, %v392_v37  ;;  %1084 = vmatpush1.bf16.msra.mxu1 %v1083_v39  ;;  %v400_v49 = vld [vmem:[%s1576_s20 + $0x148] sm:$0xff]  ;;  %v1087_v50 = vpack.c.bf16 %v381_v43, %v377_v42  ;;  %v386_v51 = vld [vmem:[%s1576_s20 + $0xd8] sm:$0xff] }
  0x8d   : > { %v395_v46 = vld [vmem:[%s1576_s20 + $0x120] sm:$0xff]  ;;  %v390_v52 = vld [vmem:[%s1576_s20 + $0xf8] sm:$0xff]  ;;  %v404_v53 = vld [vmem:[%s1576_s20 + $0x168] sm:$0xff] }
  0x8e   : > { %1086 = vmatprep.subr.bf16.mxu1 %v1085_v47  ;;  %v1089_v54 = vpack.c.bf16 %v390_v52, %v386_v51  ;;  %v385_v55 = vld [vmem:[%s1576_s20 + $0xd0] sm:$0xff]  ;;  %v1031_v57 = vpack.c.bf16 %v395_v46, %v391_v45  ;;  %v394_v58 = vld [vmem:[%s1576_s20 + $0x118] sm:$0xff]  ;;  %v1033_v60 = vpack.c.bf16 %v404_v53, %v400_v49  ;;  %v399_v61 = vld [vmem:[%s1576_s20 + $0x140] sm:$0xff] }
  0x8f   : > { %1024 = vmatpush1.bf16.msra.mxu0 %v1023_v28  ;;  %v389_v56 = vld [vmem:[%s1576_s20 + $0xf0] sm:$0xff]  ;;  %v398_v59 = vld [vmem:[%s1576_s20 + $0x138] sm:$0xff]  ;;  %v403_v62 = vld [vmem:[%s1576_s20 + $0x160] sm:$0xff] }
  0x90   : > { %1026 = vmatprep.subr.bf16.mxu0 %v1025_v32  ;;  %1088 = vmatpush1.bf16.msra.mxu1 %v1087_v50  ;;  %v408_v63 = vld [vmem:[%s1576_s20 + $0x188] sm:$0xff]  ;;  %v1091_v0 = vpack.c.bf16 %v389_v56, %v385_v55  ;;  %v1093_v2 = vpack.c.bf16 %v398_v59, %v394_v58  ;;  %v393_v3 = vld [vmem:[%s1576_s20 + $0x110] sm:$0xff]  ;;  %v402_v5 = vld [vmem:[%s1576_s20 + $0x158] sm:$0xff]  ;;  %v1035_v7 = vpack.c.bf16 %v403_v62, %v399_v61 }
  0x91   : > { %v412_v1 = vld [vmem:[%s1576_s20 + $0x1a8] sm:$0xff]  ;;  %1090 = vmatprep.subr.bf16.mxu1 %v1089_v54  ;;  %v397_v4 = vld [vmem:[%s1576_s20 + $0x130] sm:$0xff]  ;;  %v406_v6 = vld [vmem:[%s1576_s20 + $0x178] sm:$0xff] }
  0x92   : > { %v1037_v8 = vpack.c.bf16 %v412_v1, %v408_v63  ;;  %v407_v9 = vld [vmem:[%s1576_s20 + $0x180] sm:$0xff]  ;;  %v416_v11 = vld [vmem:[%s1576_s20 + $0x1c8] sm:$0xff]  ;;  %v1095_v12 = vpack.c.bf16 %v397_v4, %v393_v3  ;;  %v1097_v14 = vpack.c.bf16 %v406_v6, %v402_v5  ;;  %v401_v15 = vld [vmem:[%s1576_s20 + $0x150] sm:$0xff] }
  0x93   : > { %1028 = vmatpush1.bf16.msra.mxu0 %v1027_v44  ;;  %v411_v10 = vld [vmem:[%s1576_s20 + $0x1a0] sm:$0xff]  ;;  %v420_v13 = vld [vmem:[%s1576_s20 + $0x1e8] sm:$0xff]  ;;  %v405_v16 = vld [vmem:[%s1576_s20 + $0x170] sm:$0xff] }
  0x94   : > { %1030 = vmatprep.subr.bf16.mxu0 %v1029_v48  ;;  %1092 = vmatpush1.bf16.msra.mxu1 %v1091_v0  ;;  %v410_v17 = vld [vmem:[%s1576_s20 + $0x198] sm:$0xff]  ;;  %v1039_v19 = vpack.c.bf16 %v411_v10, %v407_v9  ;;  %v1041_v20 = vpack.c.bf16 %v420_v13, %v416_v11  ;;  %v415_v21 = vld [vmem:[%s1576_s20 + $0x1c0] sm:$0xff]  ;;  %v424_v23 = vld [vmem:[%s1576_s20 + $0x208] sm:$0xff]  ;;  %v1099_v24 = vpack.c.bf16 %v405_v16, %v401_v15 }
  0x95   : > { %1094 = vmatprep.subr.bf16.mxu1 %v1093_v2  ;;  %v414_v18 = vld [vmem:[%s1576_s20 + $0x1b8] sm:$0xff]  ;;  %v419_v22 = vld [vmem:[%s1576_s20 + $0x1e0] sm:$0xff]  ;;  %v428_v25 = vld [vmem:[%s1576_s20 + $0x228] sm:$0xff] }
  0x96   : > { %v1101_v26 = vpack.c.bf16 %v414_v18, %v410_v17  ;;  %v409_v27 = vld [vmem:[%s1576_s20 + $0x190] sm:$0xff]  ;;  %v418_v29 = vld [vmem:[%s1576_s20 + $0x1d8] sm:$0xff]  ;;  %v1043_v31 = vpack.c.bf16 %v419_v22, %v415_v21  ;;  %v1045_v32 = vpack.c.bf16 %v428_v25, %v424_v23  ;;  %v423_v33 = vld [vmem:[%s1576_s20 + $0x200] sm:$0xff] }
  0x97   : > { %1032 = vmatpush1.bf16.msra.mxu0 %v1031_v57  ;;  %v413_v28 = vld [vmem:[%s1576_s20 + $0x1b0] sm:$0xff]  ;;  %v422_v30 = vld [vmem:[%s1576_s20 + $0x1f8] sm:$0xff]  ;;  %v427_v34 = vld [vmem:[%s1576_s20 + $0x220] sm:$0xff] }
  0x98   : > { %1034 = vmatprep.subr.bf16.mxu0 %v1033_v60  ;;  %1096 = vmatpush1.bf16.msra.mxu1 %v1095_v12  ;;  %v432_v35 = vld [vmem:[%s1576_s20 + $0x248] sm:$0xff]  ;;  %v1103_v36 = vpack.c.bf16 %v413_v28, %v409_v27  ;;  %v1105_v38 = vpack.c.bf16 %v422_v30, %v418_v29  ;;  %v417_v39 = vld [vmem:[%s1576_s20 + $0x1d0] sm:$0xff]  ;;  %v426_v41 = vld [vmem:[%s1576_s20 + $0x218] sm:$0xff]  ;;  %v1047_v43 = vpack.c.bf16 %v427_v34, %v423_v33 }
  0x99   : > { %1098 = vmatprep.subr.bf16.mxu1 %v1097_v14  ;;  %v436_v37 = vld [vmem:[%s1576_s20 + $0x268] sm:$0xff]  ;;  %v421_v40 = vld [vmem:[%s1576_s20 + $0x1f0] sm:$0xff]  ;;  %v430_v42 = vld [vmem:[%s1576_s20 + $0x238] sm:$0xff] }
  0x9a   : > { %v1049_v44 = vpack.c.bf16 %v436_v37, %v432_v35  ;;  %v431_v45 = vld [vmem:[%s1576_s20 + $0x240] sm:$0xff]  ;;  %v440_v47 = vld [vmem:[%s1576_s20 + $0x288] sm:$0xff]  ;;  %v1107_v48 = vpack.c.bf16 %v421_v40, %v417_v39  ;;  %v1109_v50 = vpack.c.bf16 %v430_v42, %v426_v41  ;;  %v425_v51 = vld [vmem:[%s1576_s20 + $0x210] sm:$0xff] }
  0x9b   : > { %1036 = vmatpush1.bf16.msra.mxu0 %v1035_v7  ;;  %v435_v46 = vld [vmem:[%s1576_s20 + $0x260] sm:$0xff]  ;;  %v444_v49 = vld [vmem:[%s1576_s20 + $0x2a8] sm:$0xff]  ;;  %v429_v52 = vld [vmem:[%s1576_s20 + $0x230] sm:$0xff] }
  0x9c   : > { %1038 = vmatprep.subr.bf16.mxu0 %v1037_v8  ;;  %1100 = vmatpush1.bf16.msra.mxu1 %v1099_v24  ;;  %v434_v53 = vld [vmem:[%s1576_s20 + $0x258] sm:$0xff]  ;;  %v1051_v55 = vpack.c.bf16 %v435_v46, %v431_v45  ;;  %v439_v56 = vld [vmem:[%s1576_s20 + $0x280] sm:$0xff]  ;;  %v1053_v57 = vpack.c.bf16 %v444_v49, %v440_v47  ;;  %v448_v59 = vld [vmem:[%s1576_s20 + $0x2c8] sm:$0xff]  ;;  %v1111_v61 = vpack.c.bf16 %v429_v52, %v425_v51 }
  0x9d   : > { %1102 = vmatprep.subr.bf16.mxu1 %v1101_v26  ;;  %v438_v54 = vld [vmem:[%s1576_s20 + $0x278] sm:$0xff]  ;;  %v443_v58 = vld [vmem:[%s1576_s20 + $0x2a0] sm:$0xff]  ;;  %v452_v60 = vld [vmem:[%s1576_s20 + $0x2e8] sm:$0xff] }
  0x9e   : > { %v1113_v62 = vpack.c.bf16 %v438_v54, %v434_v53  ;;  %v433_v63 = vld [vmem:[%s1576_s20 + $0x250] sm:$0xff]  ;;  %v442_v2 = vld [vmem:[%s1576_s20 + $0x298] sm:$0xff]  ;;  %v1055_v4 = vpack.c.bf16 %v443_v58, %v439_v56  ;;  %v1057_v5 = vpack.c.bf16 %v452_v60, %v448_v59  ;;  %v447_v6 = vld [vmem:[%s1576_s20 + $0x2c0] sm:$0xff] }
  0x9f   : > { %1040 = vmatpush1.bf16.msra.mxu0 %v1039_v19  ;;  %v437_v0 = vld [vmem:[%s1576_s20 + $0x270] sm:$0xff]  ;;  %v446_v3 = vld [vmem:[%s1576_s20 + $0x2b8] sm:$0xff]  ;;  %v451_v7 = vld [vmem:[%s1576_s20 + $0x2e0] sm:$0xff] }
  0xa0   : > { %1042 = vmatprep.subr.bf16.mxu0 %v1041_v20  ;;  %1104 = vmatpush1.bf16.msra.mxu1 %v1103_v36  ;;  %v355_v1 = vld [vmem:[%s1574_s19] sm:$0xff]  ;;  %v456_v8 = vld [vmem:[%s1576_s20 + $0x308] sm:$0xff]  ;;  %v1115_v9 = vpack.c.bf16 %v437_v0, %v433_v63  ;;  %v1117_v11 = vpack.c.bf16 %v446_v3, %v442_v2  ;;  %v450_v14 = vld [vmem:[%s1576_s20 + $0x2d8] sm:$0xff]  ;;  %v1059_v16 = vpack.c.bf16 %v451_v7, %v447_v6 }
  0xa1   : > { %1106 = vmatprep.subr.bf16.mxu1 %v1105_v38  ;;  %574 = vmatprep.mubr.f32.mxu0 %v355_v1  ;;  %v460_v10 = vld [vmem:[%s1576_s20 + $0x328] sm:$0xff]  ;;  %v441_v12 = vld [vmem:[%s1576_s20 + $0x290] sm:$0xff]  ;;  %v454_v15 = vld [vmem:[%s1576_s20 + $0x2f8] sm:$0xff] }
  0xa2   : > { %645 = vmatprep.mubr.f32.mxu1 %v355_v1  ;;  %v445_v13 = vld [vmem:[%s1576_s20 + $0x2b0] sm:$0xff]  ;;  %v1061_v17 = vpack.c.bf16 %v460_v10, %v456_v8  ;;  %v455_v18 = vld [vmem:[%s1576_s20 + $0x300] sm:$0xff]  ;;  %v464_v20 = vld [vmem:[%s1576_s20 + $0x348] sm:$0xff]  ;;  %v1121_v23 = vpack.c.bf16 %v454_v15, %v450_v14 }
  0xa3   : > { %1044 = vmatpush1.bf16.msra.mxu0 %v1043_v31  ;;  %v459_v19 = vld [vmem:[%s1576_s20 + $0x320] sm:$0xff]  ;;  %v1119_v21 = vpack.c.bf16 %v445_v13, %v441_v12  ;;  %v468_v22 = vld [vmem:[%s1576_s20 + $0x368] sm:$0xff]  ;;  %v449_v24 = vld [vmem:[%s1576_s20 + $0x2d0] sm:$0xff] }
  0xa4   : > { %1046 = vmatprep.subr.bf16.mxu0 %v1045_v32  ;;  %1108 = vmatpush1.bf16.msra.mxu1 %v1107_v48  ;;  %v453_v25 = vld [vmem:[%s1576_s20 + $0x2f0] sm:$0xff]  ;;  %v458_v26 = vld [vmem:[%s1576_s20 + $0x318] sm:$0xff]  ;;  %v1063_v28 = vpack.c.bf16 %v459_v19, %v455_v18  ;;  %v1065_v29 = vpack.c.bf16 %v468_v22, %v464_v20  ;;  %v463_v30 = vld [vmem:[%s1576_s20 + $0x340] sm:$0xff] }
  0xa5   : > { %1110 = vmatprep.subr.bf16.mxu1 %v1109_v50  ;;  %v462_v27 = vld [vmem:[%s1576_s20 + $0x338] sm:$0xff]  ;;  %v467_v31 = vld [vmem:[%s1576_s20 + $0x360] sm:$0xff]  ;;  %v472_v32 = vld [vmem:[%s1576_s20 + $0x388] sm:$0xff]  ;;  %v1123_v33 = vpack.c.bf16 %v453_v25, %v449_v24 }
  0xa6   : > { %v476_v34 = vld [vmem:[%s1576_s20 + $0x3a8] sm:$0xff]  ;;  %v1125_v35 = vpack.c.bf16 %v462_v27, %v458_v26  ;;  %v457_v36 = vld [vmem:[%s1576_s20 + $0x310] sm:$0xff]  ;;  %v466_v38 = vld [vmem:[%s1576_s20 + $0x358] sm:$0xff]  ;;  %v1067_v40 = vpack.c.bf16 %v467_v31, %v463_v30 }
  0xa7   : > { %1048 = vmatpush1.bf16.msra.mxu0 %v1047_v43  ;;  %v461_v37 = vld [vmem:[%s1576_s20 + $0x330] sm:$0xff]  ;;  %v470_v39 = vld [vmem:[%s1576_s20 + $0x378] sm:$0xff]  ;;  %v1069_v41 = vpack.c.bf16 %v476_v34, %v472_v32  ;;  %v471_v42 = vld [vmem:[%s1576_s20 + $0x380] sm:$0xff] }
  0xa8   : > { %1050 = vmatprep.subr.bf16.mxu0 %v1049_v44  ;;  %1112 = vmatpush1.bf16.msra.mxu1 %v1111_v61  ;;  %v475_v43 = vld [vmem:[%s1576_s20 + $0x3a0] sm:$0xff]  ;;  %v480_v44 = vld [vmem:[%s1576_s20 + $0x3c8] sm:$0xff]  ;;  %v1127_v45 = vpack.c.bf16 %v461_v37, %v457_v36  ;;  %v1129_v47 = vpack.c.bf16 %v470_v39, %v466_v38  ;;  %v465_v48 = vld [vmem:[%s1576_s20 + $0x350] sm:$0xff] }
  0xa9   : > { %1114 = vmatprep.subr.bf16.mxu1 %v1113_v62  ;;  %v484_v46 = vld [vmem:[%s1576_s20 + $0x3e8] sm:$0xff]  ;;  %v469_v49 = vld [vmem:[%s1576_s20 + $0x370] sm:$0xff]  ;;  %v474_v50 = vld [vmem:[%s1576_s20 + $0x398] sm:$0xff]  ;;  %v1071_v52 = vpack.c.bf16 %v475_v43, %v471_v42 }
  0xaa   : > { %v478_v51 = vld [vmem:[%s1576_s20 + $0x3b8] sm:$0xff]  ;;  %v1073_v53 = vpack.c.bf16 %v484_v46, %v480_v44  ;;  %v479_v54 = vld [vmem:[%s1576_s20 + $0x3c0] sm:$0xff]  ;;  %v1131_v56 = vpack.c.bf16 %v469_v49, %v465_v48  ;;  %v473_v58 = vld [vmem:[%s1576_s20 + $0x390] sm:$0xff] }
  0xab   : > { %1052 = vmatpush1.bf16.msra.mxu0 %v1051_v55  ;;  %v483_v55 = vld [vmem:[%s1576_s20 + $0x3e0] sm:$0xff]  ;;  %v477_v59 = vld [vmem:[%s1576_s20 + $0x3b0] sm:$0xff]  ;;  %v482_v60 = vld [vmem:[%s1576_s20 + $0x3d8] sm:$0xff] }
  0xac   : > { %1054 = vmatprep.subr.bf16.mxu0 %v1053_v57  ;;  %1116 = vmatpush1.bf16.msra.mxu1 %v1115_v9  ;;  %v1133_v57 = vpack.c.bf16 %v478_v51, %v474_v50  ;;  %v486_v61 = vld [vmem:[%s1576_s20 + $0x3f8] sm:$0xff]  ;;  %v1075_v62 = vpack.c.bf16 %v483_v55, %v479_v54  ;;  %v1135_v63 = vpack.c.bf16 %v477_v59, %v473_v58  ;;  %v481_v1 = vld [vmem:[%s1576_s20 + $0x3d0] sm:$0xff] }
  0xad   : > { %1118 = vmatprep.subr.bf16.mxu1 %v1117_v11  ;;  %v1137_v0 = vpack.c.bf16 %v486_v61, %v482_v60  ;;  %v485_v2 = vld [vmem:[%s1576_s20 + $0x3f0] sm:$0xff] }
  0xae   : > { %v357_v3 = vld [vmem:[#allocation2] sm:$0xff] }
  0xaf   : > { %1056 = vmatpush1.bf16.msra.mxu0 %v1055_v4  ;;  %v1139_v4 = vpack.c.bf16 %v485_v2, %v481_v1  ;;  %v948_v8 = vld [vmem:[%s1576_s20 + $0x400] ss:$8 sm:$0xf] }
  0xb0   : > { %1058 = vmatprep.subr.bf16.mxu0 %v1057_v5  ;;  %1120 = vmatpush1.bf16.msra.mxu1 %v1119_v21  ;;  %v490_v5 = vlaneseq }
  0xb1   : > { %1122 = vmatprep.subr.bf16.mxu1 %v1121_v23 }
  0xb2   : > { %v491_v6 = vshrl.u32 %v490_v5, 7 }
  0xb3   : > { %1060 = vmatpush1.bf16.msra.mxu0 %v1059_v16 }
  0xb4   : > { %1062 = vmatprep.subr.bf16.mxu0 %v1061_v17  ;;  %1124 = vmatpush1.bf16.msra.mxu1 %v1123_v33  ;;  %v492_v7 = vsub.s32 0, %v491_v6  ;;  %v496_v9 = vsub.s32 1, %v491_v6  ;;  %v504_v12 = vsub.s32 3, %v491_v6  ;;  %v500_v20 = vsub.s32 2, %v491_v6  ;;  %v952_v33 = vld [vmem:[%s1574_s19 + $0x8] sm:$0xff] }
  0xb5   : > { %1126 = vmatprep.subr.bf16.mxu1 %v1125_v35 }
  0xb6   : > { %v493_v10 = vrot.slane %v948_v8, %v492_v7  ;;  %v497_v11 = vrot.slane %v948_v8, %v496_v9  ;;  %v505_v18 = vrot.slane %v948_v8, %v504_v12  ;;  %v501_v24 = vrot.slane %v948_v8, %v500_v20 }
  0xb7   : > { %1064 = vmatpush1.bf16.msra.mxu0 %v1063_v28 }
  0xb8   : > { %1066 = vmatprep.subr.bf16.mxu0 %v1065_v29  ;;  %1128 = vmatpush1.bf16.msra.mxu1 %v1127_v45 }
  0xb9   : > { %1130 = vmatprep.subr.bf16.mxu1 %v1129_v47 }
  0xbb   : > { %1068 = vmatpush1.bf16.msra.mxu0 %v1067_v40 }
  0xbc   : > { %1070 = vmatprep.subr.bf16.mxu0 %v1069_v41  ;;  %1132 = vmatpush1.bf16.msra.mxu1 %v1131_v56 }
  0xbd   : > { %1134 = vmatprep.subr.bf16.mxu1 %v1133_v57 }
  0xbf   : > { %1072 = vmatpush1.bf16.msra.mxu0 %v1071_v52 }
  0xc0   : > { %1074 = vmatprep.subr.bf16.mxu0 %v1073_v53  ;;  %1136 = vmatpush1.bf16.msra.mxu1 %v1135_v63 }
  0xc1   : > { %1138 = vmatprep.subr.bf16.mxu1 %v1137_v0 }
  0xc3   : > { %1076 = vmatpush1.bf16.msra.mxu0 %v1075_v62 }
  0xc4   : > { %1140 = vmatpush1.bf16.msra.mxu1 %v1139_v4 }
  0xc6   : > { %575 = vmatmul.mubr.f32.vlgmr.msra.gmra.mrb[0].mxu0 %v357_v3 }
  0xc7   : > { %646 = vmatmul.mubr.f32.vlgmr.msra.gmra.mrb[0].mxu1 %v357_v3 }
 0x199   : > { %v576_v13 = vpop.f32.mrb[0].mxu0 }
 0x19a   : > { %v577_v14 = vadd.f32 %v576_v13, %v493_v10  ;;  %v578_v15 = vpop.f32.mrb[1].mxu0  ;;  %v647_v21 = vpop.f32.mrb[0].mxu1 }
 0x19b   : > { %v579_v16 = vadd.f32 %v578_v15, %v497_v11  ;;  %v649_v22 = vpop.f32.mrb[1].mxu1  ;;  %v648_v26 = vadd.f32 %v647_v21, %v501_v24 }
 0x19c   : > { %v949_v17 = vmul.f32 -1.442695, %v577_v14  ;;  %v650_v23 = vadd.f32 %v649_v22, %v505_v18 }
 0x19d   : > { %v950_v19 = vmul.f32 -1.442695, %v579_v16 }
 0x19e   : > { %1230 = vpow2.f32 %v949_v17  ;;  %v951_v25 = vmul.f32 -1.442695, %v650_v23 }
 0x19f   : > { %1232 = vpow2.f32 %v950_v19 }
 0x1a0   : > { %1234 = vpow2.f32 %v951_v25 }
 0x1a1   : > { %1236 = vtanh.f32 %v648_v26 }
 0x1a8   : > { %v1231_v27 = vpop.eup %1230 }
 0x1a9   : > { %v1233_v28 = vpop.eup %1232  ;;  %v655_v29 = vadd.f32 1.0, %v1231_v27 }
 0x1aa   : > { %v661_v30 = vadd.f32 1.0, %v1233_v28  ;;  %v1235_v31 = vpop.eup %1234 }
 0x1ab   : > { %1238 = vrcp.f32 %v655_v29  ;;  %v1237_v32 = vpop.eup %1236  ;;  %v668_v35 = vadd.f32 1.0, %v1235_v31 }
 0x1ac   : > { %1240 = vrcp.f32 %v661_v30 }
 0x1ad   : > { %1242 = vrcp.f32 %v668_v35 }
 0x1b5   : > { %v1239_v34 = vpop.eup %1238 }
 0x1b6   : > { %v1241_v36 = vpop.eup %1240  ;;  %v674_v37 = vmul.f32 %v1239_v34, %v1237_v32 }
 0x1b7   : > { %v673_v38 = vmul.f32 %v1241_v36, %v952_v33  ;;  %v1243_v40 = vpop.eup %1242 }
 0x1b9   : > { %v675_v39 = vadd.f32 %v674_v37, %v673_v38 }
 0x1bb   : > { %1244 = vtanh.f32 %v675_v39  ;;  %953 = vst [vmem:[%s1586_s30 + $0x8] sm:$0xff] %v675_v39 }
 0x1c2   : > { %684 = sbr.rel (%p954_p6) target bundleno = 457 (0x1c9), region = 98 }
 0x1c5   : > { %v1245_v41 = vpop.eup %1244 }
 0x1c6   : > { %v677_v42 = vmul.f32 %v1245_v41, %v1243_v40 }
 0x1c8   : > { %678 = vst [vmem:[%s1586_s30] sm:$0xff] %v677_v42  ;;  %685 = vst [vmem:[#allocation2] sm:$0xff] (!%p954_p6), %v677_v42 }
 0x1c9 PF: > { %p955_p7 = scmp.ne.s32.totalorder %s1434_s25, 1 }
 0x1ca   : > { %v690_v43 = vld [vmem:[#allocation6] sm:$0xff] (!%p955_p7)  ;;  %v691_v44 = vld [vmem:[#allocation6 + $0x8] sm:$0xff] (!%p955_p7)  ;;  %v692_v45 = vld [vmem:[#allocation6 + $0x10] sm:$0xff] (!%p955_p7)  ;;  %v1377_v46 = vmov (!%p955_p7), 0.0|0.0   ;;  %vm1378_vm0 = vmmov (!%p955_p7), 0   ;;  %v1379_v49 = vmov (!%p955_p7), 0.0  }
 0x1cb   : > { %689 = sbr.rel (%p955_p7) target bundleno = 707 (0x2c3), region = 102  ;;  %1141 = vmatprep.subr.bf16.mxu0 (!%p955_p7), %v1377_v46  ;;  %v1142_v47 = vpack.c.bf16 (!%p955_p7), %v691_v44, %v690_v43  ;;  %v693_v48 = vld [vmem:[#allocation6 + $0x18] sm:$0xff] (!%p955_p7)  ;;  %1010 = vmatprep.mubr.msk.f32.mxu0 (!%p955_p7), %vm1378_vm0, %v1379_v49  ;;  %v694_v51 = vld [vmem:[#allocation6 + $0x20] sm:$0xff] (!%p955_p7)  ;;  %v695_v52 = vld [vmem:[#allocation6 + $0x28] sm:$0xff] (!%p955_p7) }
 0x1cc   : > { %v1145_v50 = vpack.c.bf16 (!%p955_p7), %v693_v48, %v692_v45  ;;  %v1148_v53 = vpack.c.bf16 (!%p955_p7), %v695_v52, %v694_v51  ;;  %v696_v54 = vld [vmem:[#allocation6 + $0x30] sm:$0xff] (!%p955_p7)  ;;  %v697_v55 = vld [vmem:[#allocation6 + $0x38] sm:$0xff] (!%p955_p7)  ;;  %v698_v57 = vld [vmem:[#allocation6 + $0x40] sm:$0xff] (!%p955_p7) }
 0x1cd   : > { %1143 = vmatpush3.bf16.msra.mxu0 (!%p955_p7), %v1142_v47  ;;  %v1151_v56 = vpack.c.bf16 (!%p955_p7), %v697_v55, %v696_v54  ;;  %v699_v58 = vld [vmem:[#allocation6 + $0x48] sm:$0xff] (!%p955_p7)  ;;  %v700_v60 = vld [vmem:[#allocation6 + $0x50] sm:$0xff] (!%p955_p7)  ;;  %v701_v61 = vld [vmem:[#allocation6 + $0x58] sm:$0xff] (!%p955_p7) }
 0x1ce   : > { %1144 = vmatprep.subr.bf16.mxu0 (!%p955_p7), %v1377_v46  ;;  %v1154_v59 = vpack.c.bf16 (!%p955_p7), %v699_v58, %v698_v57  ;;  %v1157_v62 = vpack.c.bf16 (!%p955_p7), %v701_v61, %v700_v60  ;;  %v702_v63 = vld [vmem:[#allocation6 + $0x60] sm:$0xff] (!%p955_p7)  ;;  %v703_v0 = vld [vmem:[#allocation6 + $0x68] sm:$0xff] (!%p955_p7)  ;;  %v704_v2 = vld [vmem:[#allocation6 + $0x70] sm:$0xff] (!%p955_p7) }
 0x1cf   : > { %v1160_v1 = vpack.c.bf16 (!%p955_p7), %v703_v0, %v702_v63  ;;  %v705_v3 = vld [vmem:[#allocation6 + $0x78] sm:$0xff] (!%p955_p7)  ;;  %v956_v5 = vld [vmem:[#allocation8] ss:$0 sm:$0xff] (!%p955_p7) }
 0x1d0   : > { %v1163_v4 = vpack.c.bf16 (!%p955_p7), %v705_v3, %v704_v2 }
 0x1d1   : > { %1146 = vmatpush3.bf16.msra.mxu0 (!%p955_p7), %v1145_v50 }
 0x1d2   : > { %1147 = vmatprep.subr.bf16.mxu0 %v1377_v46 }
 0x1d5   : > { %1149 = vmatpush3.bf16.msra.mxu0 %v1148_v53 }
 0x1d6   : > { %1150 = vmatprep.subr.bf16.mxu0 %v1377_v46 }
 0x1d9   : > { %1152 = vmatpush3.bf16.msra.mxu0 %v1151_v56 }
 0x1da   : > { %1153 = vmatprep.subr.bf16.mxu0 %v1377_v46 }
 0x1dd   : > { %1155 = vmatpush3.bf16.msra.mxu0 %v1154_v59 }
 0x1de   : > { %1156 = vmatprep.subr.bf16.mxu0 %v1377_v46 }
 0x1e1   : > { %1158 = vmatpush3.bf16.msra.mxu0 %v1157_v62 }
 0x1e2   : > { %1159 = vmatprep.subr.bf16.mxu0 %v1377_v46 }
 0x1e5   : > { %1161 = vmatpush3.bf16.msra.mxu0 %v1160_v1 }
 0x1e6   : > { %1162 = vmatprep.subr.bf16.mxu0 %v1377_v46 }
 0x1e9   : > { %1164 = vmatpush3.bf16.msra.mxu0 %v1163_v4 }
 0x1ec   : > { %1011 = vmatmul.mubr.f32.vlgmr.msra.gmra.mrb[0].mxu0 %v677_v42 }
 0x2bf   : > { %v779_v6 = vpop.f32.mrb[0].mxu0 }
 0x2c0   : > { %v780_v7 = vadd.f32 %v956_v5, %v779_v6  ;;  %v1012_v8 = vpop.f32.mrb[1].mxu0 }
 0x2c2   : > { %783 = vst [vmem:[%s1758_s6] sm:$0xff] %v780_v7 }
 0x2c3 PF: > { %p1775_p9 = scmp.ne.s32.totalorder %s1765_s8, 0 }
 0x2c4   : > { %s958_s16 = sshll.u32 (%p1775_p9), %s1434_s25, 3  ;;  %v822_v9 = vld [vmem:[%s1586_s30] sm:$0xff] (%p1775_p9)  ;;  %v824_v10 = vld [vmem:[%s1586_s30 + $0x8] sm:$0xff] (%p1775_p9) }
 0x2c5   : > { %790 = sbr.rel (!%p1775_p9) target bundleno = 716 (0x2cc), region = 106  ;;  %s792_s27 = scalar_lea.vmem (%p1775_p9), %s1757_s5, %s958_s16 }
 0x2c6   : > { %823 = vst [vmem:[%s792_s27] sm:$0xff] (%p1775_p9), %v822_v9  ;;  %825 = vst [vmem:[%s792_s27 + $0x10] sm:$0xff] (%p1775_p9), %v824_v10 }
 0x2cc PF: > { %p18_p13 = scmp.ge.s32.totalorder %s1437_s26, 4   ;;  %s1776_s21 = smov %s1360_s22 }
 0x2cd   : > { %s1777_s22 = smov %s1364_s23  ;;  %s1778_s23 = smov %s1447_s29 }
 0x2ce   : > { %s1779_s24 = smov %s1437_s26  ;;  %20 = sbr.rel (!%p18_p13) target bundleno = 4 (0x4), region = 195 }
 0x2d5   :  { %847 = vsyncpa [#allocation5], 1 }
 0x2d6   :  { %849 = vsyncpa [#allocation5 + $0x1], 1 }
 0x2d7   :  { %850 = vsyncpa [#allocation7], 1 }

</bundles_post_ra>
